<compile_context>
chip_gen: v7x
topology: tpu7x:2x2x1
jax: 0.10.0
libtpu: 0.0.40
codegen_flags: <defaults>
</compile_context>

<pallas_src>
import math
import numpy as np
import jax
import jax.numpy as jnp
from jax.experimental import pallas as pl
from jax.experimental.pallas import tpu as pltpu


# ---------------------------------------------------------------------------
# Pallas kernel
# ---------------------------------------------------------------------------
def _make_shared_kernel(log_binwidth_last):
    """Kernel for one (region-tile, cluster) grid step."""

    def kernel(delta_ref, bias_ref, e_ref, w_ref, klsq_ref):
        delta = delta_ref[0]        # (TR, K) f32  raw deltas, this cluster
        bias = bias_ref[...]        # (TR, K) f32  raw per-region bias (resident)
        e = e_ref[...]              # (K, NB) bf16 0/1 multiresolution expansion

        # bias folded in with a VPU add; single bf16 MXU matmul does the
        # hierarchical repeat-expansion + accumulation over all levels.
        combined = (delta + bias).astype(jnp.bfloat16)
        acc = jnp.dot(combined, e, preferred_element_type=jnp.float32)  # (TR,NB)

        # log_softmax over final bins; -log(binwidth_last) folded into normalizer
        m = jnp.max(acc, axis=-1, keepdims=True)
        z = jnp.sum(jnp.exp(acc - m), axis=-1, keepdims=True)
        w_ref[0] = acc - (m + jnp.log(z) + log_binwidth_last)

        # per-block partial KL statistic: sum of squares of raw deltas (f32).
        # Padded region rows / padded lanes are exactly zero -> contribute 0.
        d2 = delta * delta
        ssq = jnp.sum(jnp.sum(d2, axis=1, keepdims=True), axis=0, keepdims=True)
        klsq_ref[...] = jnp.broadcast_to(ssq, klsq_ref.shape)

    return kernel


# ---------------------------------------------------------------------------
# Module (parameters + forward wrapper)
# ---------------------------------------------------------------------------
class SharedPallas:
    # regions per grid step (review: 256-512).  With TR=256 a step moves
    # ~256 KiB of deltas + a resident 256 KiB bias + 128 KiB output; total
    # double-buffered VMEM use ~1.5 MiB -> fits all of v5e/v6e/v7x easily.
    MAX_TR = 256

    def __init__(self, n_regions, n_clusters, window, binwidths,
                 delta_p_scale=1.5, seed=0):
        self.n_regions = n_regions
        self.n_clusters = n_clusters
        self.window = window
        self.binwidths = tuple(int(b) for b in binwidths)
        self.total_width = window[1] - window[0]
        self.n_final_bins = self.total_width // self.binwidths[-1]
        self.delta_scale = float(delta_p_scale)

        # level geometry (mirrors the torch __init__)
        self.nsections, self.nbin_sections, self.nbins = [], [], []
        current_width = self.total_width
        for bw in self.binwidths:
            nbin_section = current_width // bw
            nsection = self.total_width // (bw * nbin_section)
            self.nsections.append(nsection)
            self.nbin_sections.append(nbin_section)
            self.nbins.append(nsection * nbin_section)
            current_width = bw
        self.reshapes = [self.n_final_bins // nb for nb in self.nbins]
        self.sum_nbins = int(sum(self.nbins))
        self.k_padded = ((self.sum_nbins + 127) // 128) * 128

        # constant 0/1 expansion matrix: row (level offset + b) marks the
        # final-bin lanes that raw bin b of that level repeats into; summing
        # over levels is implicit in the single matmul.  Stored bf16 (exact).
        E = np.zeros((self.k_padded, self.n_final_bins), np.float32)
        off = 0
        for nb, rep in zip(self.nbins, self.reshapes):
            for b in range(nb):
                E[off + b, b * rep:(b + 1) * rep] = 1.0
            off += nb
        self.expand_mat = jnp.asarray(E, dtype=jnp.bfloat16)

        # Normal(0, scale) log-prob pieces (KL finished on the wrapper side)
        self.logprob_const = (-math.log(self.delta_scale)
                              - 0.5 * math.log(2.0 * math.pi))
        self.inv_scale2 = 1.0 / (self.delta_scale ** 2)

        # deterministic parameter init (module default is zeros; small random
        # normals so the compute path is exercised non-trivially).
        key = jax.random.PRNGKey(seed)
        self.w_params, self.w_delta_params = [], []
        for level in range(len(self.binwidths)):
            key, k1, k2 = jax.random.split(key, 3)
            nsec, nbin = self.nsections[level], self.nbin_sections[level]
            self.w_params.append(
                0.1 * jax.random.normal(k1, (n_regions, nsec, nbin), jnp.float32))
            self.w_delta_params.append(
                0.1 * jax.random.normal(k2, (n_regions, n_clusters, nsec, nbin),
                                        jnp.float32))

        # Pre-concatenate all levels and pre-pad to K lanes ONCE, so per-call
        # glue is a single gather per table (no concat / lane-pad per call).
        # delta table is stored cluster-major (C, n_regions, K) so the kernel
        # layout needs no transpose.
        bias_parts = [p.reshape(n_regions, nb)
                      for p, nb in zip(self.w_params, self.nbins)]
        delta_parts = [p.reshape(n_regions, n_clusters, nb).transpose(1, 0, 2)
                       for p, nb in zip(self.w_delta_params, self.nbins)]
        lane_pad = self.k_padded - self.sum_nbins
        self.bias_table = jnp.pad(jnp.concatenate(bias_parts, axis=-1),
                                  ((0, 0), (0, lane_pad)))              # (R, K)
        self.delta_table = jnp.pad(jnp.concatenate(delta_parts, axis=-1),
                                   ((0, 0), (0, 0), (0, lane_pad)))     # (C, R, K)

        # TODO(synk): on v5e (DMA-bound) the delta/bias streams could be
        # bfloat16 (upcast in-kernel) to halve HBM traffic; kept f32 so the
        # validation tolerances stay tight.

        self._kernel = _make_shared_kernel(math.log(float(self.binwidths[-1])))

    # -- w / kl computation (Pallas hot path) --------------------------------
    def _calculate_w(self, regions_oi):
        R = int(regions_oi.shape[0])
        C = self.n_clusters
        NB = self.n_final_bins
        K = self.k_padded
        SN = self.sum_nbins

        # glue: one gather per pre-fused table
        delta3d = self.delta_table[:, regions_oi]         # (C, R, K)
        bias2d = self.bias_table[regions_oi]              # (R, K)

        # tile sizing over regions
        if R <= self.MAX_TR:
            TR, Rp, nblk = R, R, 1          # block == full region dim, no pad
        else:
            TR = self.MAX_TR                # multiple of 8 -> aligned blocks
            nblk = -(-R // TR)
            Rp = nblk * TR
        if Rp != R:
            delta3d = jnp.pad(delta3d, ((0, 0), (0, Rp - R), (0, 0)))
            bias2d = jnp.pad(bias2d, ((0, Rp - R), (0, 0)))

        in_specs = [
            pl.BlockSpec((1, TR, K), lambda r, c: (c, r, 0)),   # raw deltas
            pl.BlockSpec((TR, K), lambda r, c: (r, 0)),         # bias (resident over c)
            pl.BlockSpec((K, NB), lambda r, c: (0, 0)),         # expansion (resident)
        ]
        out_specs = [
            pl.BlockSpec((1, TR, NB), lambda r, c: (c, r, 0)),      # w (lane-dense)
            pl.BlockSpec((1, 1, 1, 128), lambda r, c: (r, c, 0, 0)),  # KL partial
        ]
        out_shape = [
            jax.ShapeDtypeStruct((C, Rp, NB), jnp.float32),
            jax.ShapeDtypeStruct((nblk, C, 1, 128), jnp.float32),
        ]

        w3d, klsq = pl.pallas_call(
            self._kernel,
            out_shape=out_shape,
            grid_spec=pltpu.PrefetchScalarGridSpec(
                num_scalar_prefetch=0,
                grid=(nblk, C),                 # inner cluster axis keeps bias resident
                in_specs=in_specs,
                out_specs=out_specs,
            ),
            compiler_params=pltpu.CompilerParams(
                # no cross-step state (per-block KL partials) -> both axes
                # parallel; the cluster axis gives >=2 blocks for v7x megacore.
                dimension_semantics=("parallel", "parallel"),
                vmem_limit_bytes=32 * 1024 * 1024),
        )(delta3d, bias2d, self.expand_mat)

        sumsq = jnp.sum(klsq[:, :, 0, 0])
        kl = (jnp.float32(self.logprob_const * (R * C * SN))
              - jnp.float32(0.5 * self.inv_scale2) * sumsq)
        return w3d, kl   # w3d is cluster-major (C, Rp, NB)

    # -- forward --------------------------------------------------------------
    def forward(self, regions_oi, coordinates, local_region_ix, local_cell_ix,
                clustering_indices):
        w3d, w_kl = self._calculate_w(regions_oi)
        coords = jnp.clip(coordinates, self.window[0], self.window[1] - 1) \
            - self.window[0]
        bin_ix = (coords // self.binwidths[-1]).astype(jnp.int32)
        cluster_ix = clustering_indices[local_cell_ix]
        # TODO(synk): the sparse EmbeddingTensor row lookup and this final
        # data-dependent likelihood gather stay as XLA glue (no tile structure).
        likelihood = w3d[cluster_ix, local_region_ix, bin_ix]
        return likelihood, w_kl

    # -- pure-JAX reference (for validation) ----------------------------------
    def reference_calculate_w(self, regions_oi):
        R, C, NB = regions_oi.shape[0], self.n_clusters, self.n_final_bins
        w = jnp.zeros((R, C, NB), jnp.float32)
        kl = jnp.float32(0.0)
        for level in range(len(self.binwidths)):
            w_delta = self.w_delta_params[level][regions_oi]
            w_bias = self.w_params[level][regions_oi]
            w_level = (w_bias[:, None] + w_delta).reshape(R, C, -1)
            rep = self.reshapes[level]
            w = (w.reshape(R, C, self.nbins[level], rep)
                 + w_level[..., None]).reshape(R, C, NB)
            lp = (-0.5 * (w_delta / self.delta_scale) ** 2
                  - jnp.log(self.delta_scale) - 0.5 * jnp.log(2.0 * jnp.pi))
            kl = kl + lp.sum()
        w = jax.nn.log_softmax(w, axis=-1) - jnp.log(float(self.binwidths[-1]))
        return w, kl


# ---------------------------------------------------------------------------
def _run_case(model, regions_oi, n_cuts, n_cells, key):
    window = model.window
    k1, k2, k3, k4 = jax.random.split(key, 4)
    coordinates = jax.random.randint(k1, (n_cuts,), window[0] - 100,
                                     window[1] + 100, jnp.int32)
    local_region_ix = jax.random.randint(k2, (n_cuts,), 0,
                                         regions_oi.shape[0], jnp.int32)
    local_cell_ix = jax.random.randint(k3, (n_cuts,), 0, n_cells, jnp.int32)
    clustering_indices = jax.random.randint(k4, (n_cells,), 0,
                                            model.n_clusters, jnp.int32)

    likelihood, kl = model.forward(regions_oi, coordinates, local_region_ix,
                                   local_cell_ix, clustering_indices)
    jax.block_until_ready((likelihood, kl))

    # validate against pure-JAX reference (tolerances account for the bf16
    # MXU operands of the expansion matmul; KL stays f32 end-to-end)
    w_ref, kl_ref = model.reference_calculate_w(regions_oi)
    coords = jnp.clip(coordinates, window[0], window[1] - 1) - window[0]
    bin_ix = coords // model.binwidths[-1]
    lik_ref = w_ref[local_region_ix, clustering_indices[local_cell_ix], bin_ix]
    assert jnp.allclose(likelihood, lik_ref, rtol=1e-2, atol=1e-2), \
        (likelihood, lik_ref)
    assert jnp.allclose(kl, kl_ref, rtol=1e-3, atol=0.5), (kl, kl_ref)


if __name__ == "__main__":
    # synthetic configuration (divisions all exact, n_final_bins = 128)
    window = (0, 6400)
    binwidths = (800, 400, 200, 100, 50)
    n_regions = 384
    n_clusters = 4

    model = SharedPallas(n_regions, n_clusters, window, binwidths, seed=0)
    key = jax.random.PRNGKey(0)
    key, ka, kb = jax.random.split(key, 3)

    # case A: small minibatch -> single region block (TR == R), grid = (1, C)
    regions_a = jnp.array([0, 2, 3, 5], dtype=jnp.int32)
    _run_case(model, regions_a, n_cuts=16, n_cells=5, key=ka)

    # case B: R=320 > MAX_TR -> 2 region blocks with zero-padding, grid = (2, C)
    regions_b = jax.random.permutation(kb, n_regions)[:320].astype(jnp.int32)
    _run_case(model, regions_b, n_cuts=64, n_cells=7, key=key)

    print("KERNEL_OK")
</pallas_src>

<mosaic_0001>
module attributes {stable_mosaic.version = 11 : i64} {
  func.func @kernel(%arg0: i32, %arg1: i32, %arg2: memref<1x4x256xf32, #tpu.memory_space<vmem>>, %arg3: memref<4x256xf32, #tpu.memory_space<vmem>>, %arg4: memref<256x128xbf16, #tpu.memory_space<vmem>>, %arg5: memref<1x4x128xf32, #tpu.memory_space<vmem>>, %arg6: memref<1x1x1x128xf32, #tpu.memory_space<vmem>>) attributes {dimension_semantics = [#tpu.dimension_semantics<parallel>, #tpu.dimension_semantics<parallel>], iteration_bounds = array<i64: 1, 4>, scalar_prefetch = 0 : i64, scratch_operands = 0 : i64, tpu.core_type = #tpu.core_type<tc>, window_params = [{transform_indices = @transform_0, window_bounds = array<i64: 1, 4, 256>}, {transform_indices = @transform_1, window_bounds = array<i64: 4, 256>}, {pipeline_mode = #tpu.pipeline_mode<synchronous>, transform_indices = @transform_2, window_bounds = array<i64: 256, 128>}, {transform_indices = @transform_3, window_bounds = array<i64: 1, 4, 128>}, {transform_indices = @transform_4, window_bounds = array<i64: 1, 1, 1, 128>}]} {
    %c0 = arith.constant 0 : index
    %c0_0 = arith.constant 0 : index
    %c0_1 = arith.constant 0 : index
    %0 = vector.load %arg2[%c0, %c0_0, %c0_1] : memref<1x4x256xf32, #tpu.memory_space<vmem>>, vector<1x4x256xf32>
    %1 = vector.shape_cast %0 : vector<1x4x256xf32> to vector<4x256xf32>
    %c0_2 = arith.constant 0 : index
    %c0_3 = arith.constant 0 : index
    %2 = vector.load %arg3[%c0_2, %c0_3] : memref<4x256xf32, #tpu.memory_space<vmem>>, vector<4x256xf32>
    %c0_4 = arith.constant 0 : index
    %c0_5 = arith.constant 0 : index
    %3 = vector.load %arg4[%c0_4, %c0_5] : memref<256x128xbf16, #tpu.memory_space<vmem>>, vector<256x128xbf16>
    %4 = arith.addf %1, %2 : vector<4x256xf32>
    %5 = arith.truncf %4 : vector<4x256xf32> to vector<4x256xbf16>
    %cst = arith.constant dense<0.000000e+00> : vector<4x128xf32>
    %6 = tpu.matmul %5, %3, %cst {dimension_numbers = #tpu.dot_dimension_numbers<[1], [0], [0], [1], [0, 0, 1, 1], [], []>} : vector<4x256xbf16>, vector<256x128xbf16>, vector<4x128xf32> -> vector<4x128xf32>
    %cst_6 = arith.constant dense<0xFF800000> : vector<4xf32>
    %7 = vector.multi_reduction <maximumf>, %6, %cst_6 [1] : vector<4x128xf32> to vector<4xf32>
    %8 = vector.shape_cast %7 : vector<4xf32> to vector<4x1xf32>
    %9 = vector.broadcast %8 : vector<4x1xf32> to vector<4x128xf32>
    %10 = arith.subf %6, %9 : vector<4x128xf32>
    %11 = math.exp %10 : vector<4x128xf32>
    %cst_7 = arith.constant dense<0.000000e+00> : vector<4xf32>
    %12 = vector.multi_reduction <add>, %11, %cst_7 [1] : vector<4x128xf32> to vector<4xf32>
    %13 = vector.shape_cast %12 : vector<4xf32> to vector<4x1xf32>
    %14 = math.log %13 : vector<4x1xf32>
    %15 = arith.addf %8, %14 : vector<4x1xf32>
    %cst_8 = arith.constant 3.91202307 : f32
    %16 = vector.broadcast %cst_8 : f32 to vector<4x1xf32>
    %17 = arith.addf %15, %16 : vector<4x1xf32>
    %18 = vector.broadcast %17 : vector<4x1xf32> to vector<4x128xf32>
    %19 = arith.subf %6, %18 : vector<4x128xf32>
    %c0_9 = arith.constant 0 : index
    %c0_10 = arith.constant 0 : index
    %c0_11 = arith.constant 0 : index
    %20 = vector.load %arg5[%c0_9, %c0_10, %c0_11] : memref<1x4x128xf32, #tpu.memory_space<vmem>>, vector<1x4x128xf32>
    %21 = vector.shape_cast %20 : vector<1x4x128xf32> to vector<4x128xf32>
    %22 = vector.shape_cast %19 : vector<4x128xf32> to vector<1x4x128xf32>
    tpu.vector_store %arg5[%c0_9, %c0_10, %c0_11], %22 {strides = array<i32>} : memref<1x4x128xf32, #tpu.memory_space<vmem>>, vector<1x4x128xf32>,
    %23 = arith.mulf %1, %1 : vector<4x256xf32>
    %cst_12 = arith.constant dense<0.000000e+00> : vector<4xf32>
    %24 = vector.multi_reduction <add>, %23, %cst_12 [1] : vector<4x256xf32> to vector<4xf32>
    %25 = vector.shape_cast %24 : vector<4xf32> to vector<4x1xf32>
    %cst_13 = arith.constant dense<0.000000e+00> : vector<1xf32>
    %26 = vector.multi_reduction <add>, %25, %cst_13 [0] : vector<4x1xf32> to vector<1xf32>
    %27 = vector.shape_cast %26 : vector<1xf32> to vector<1x1xf32>
    %28 = vector.shape_cast %27 : vector<1x1xf32> to vector<1x1x1x1xf32>
    %29 = vector.broadcast %28 : vector<1x1x1x1xf32> to vector<1x1x1x128xf32>
    %c0_14 = arith.constant 0 : index
    %c0_15 = arith.constant 0 : index
    %c0_16 = arith.constant 0 : index
    %c0_17 = arith.constant 0 : index
    %30 = vector.load %arg6[%c0_14, %c0_15, %c0_16, %c0_17] : memref<1x1x1x128xf32, #tpu.memory_space<vmem>>, vector<1x1x1x128xf32>
    tpu.vector_store %arg6[%c0_14, %c0_15, %c0_16, %c0_17], %29 {strides = array<i32>} : memref<1x1x1x128xf32, #tpu.memory_space<vmem>>, vector<1x1x1x128xf32>,
    return
  }
  func.func @transform_0(%arg0: i32, %arg1: i32) -> (i32, i32, i32) {
    %c0_i32 = arith.constant 0 : i32
    %c0_i32_0 = arith.constant 0 : i32
    return %arg1, %arg0, %c0_i32 : i32, i32, i32
  }
  func.func @transform_1(%arg0: i32, %arg1: i32) -> (i32, i32) {
    %c0_i32 = arith.constant 0 : i32
    %c0_i32_0 = arith.constant 0 : i32
    return %arg0, %c0_i32 : i32, i32
  }
  func.func @transform_2(%arg0: i32, %arg1: i32) -> (i32, i32) {
    %c0_i32 = arith.constant 0 : i32
    %c0_i32_0 = arith.constant 0 : i32
    %c0_i32_1 = arith.constant 0 : i32
    return %c0_i32, %c0_i32_0 : i32, i32
  }
  func.func @transform_3(%arg0: i32, %arg1: i32) -> (i32, i32, i32) {
    %c0_i32 = arith.constant 0 : i32
    %c0_i32_0 = arith.constant 0 : i32
    return %arg1, %arg0, %c0_i32 : i32, i32, i32
  }
  func.func @transform_4(%arg0: i32, %arg1: i32) -> (i32, i32, i32, i32) {
    %c0_i32 = arith.constant 0 : i32
    %c0_i32_0 = arith.constant 0 : i32
    %c0_i32_1 = arith.constant 0 : i32
    return %arg0, %arg1, %c0_i32, %c0_i32_0 : i32, i32, i32, i32
  }
}

</mosaic_0001>

<bundles_post_ra>
// kernel: tpu_custom_call.1
= control target key start
LH: loop header
LB: loop body
LE: loop exit
PB: predicated region body
PF: predicated region fallthrough
CT: control target
= control target key end

     0   :  { %10 = vsyncpa [#allocation3], 0  ;;  %s1339_s0 = inlined_call_operand.hbm [shape: f32[4,4,256], index: 0, kind: input, shape index: {}]   ;;  %s1340_s1 = inlined_call_operand.hbm [shape: f32[4,256], index: 1, kind: input, shape index: {}]   ;;  %s1341_s2 = inlined_call_operand.hbm [shape: bf16[256,128], index: 2, kind: input, shape index: {}]   ;;  %s1342_s3 = inlined_call_operand.hbm [shape: f32[4,4,128], index: 3, kind: output, shape index: {0}]   ;;  %s1343_s4 = inlined_call_operand.hbm [shape: f32[1,4,1,128], index: 4, kind: output, shape index: {1}]  }
   0x1   :  { %12 = vsyncpa [#allocation3 + $0x1], 0 }
   0x2   :  { %13 = vsyncpa [#allocation6], 0 }
   0x3   :  { %14 = vsyncpa [#allocation4], 0 }
   0x4   :  { %16 = vsyncpa [#allocation4 + $0x1], 0 }
   0x5   :  { %17 = vsyncpa [#allocation10], 0 }
   0x6   :  { %19 = vsyncpa [#allocation10 + $0x1], 0  ;;  %s1062_s15 = smov 0   ;;  %s1064_s16 = smov 0  }
   0x7   :  { %s1066_s17 = smov 0   ;;  %s1068_s18 = smov 0  }
   0x8   :  { %s1070_s19 = smov 0   ;;  %s1072_s20 = smov 0  }
   0x9 LB: > { %s656_s21 = sadd.s32 4294967295, %s1028_s20   ;;  %s657_s22 = sadd.s32 4294967294, %s1028_s20   ;;  %s1028_s20 = sphi %s1072_s20, %s25_s20   ;;  %s1024_s19 = sphi %s1070_s19, %s1365_s19   ;;  %s1020_s18 = sphi %s1068_s18, %s1364_s18   ;;  %s1016_s17 = sphi %s1066_s17, %s1363_s17   ;;  %s1012_s16 = sphi %s1064_s16, %s1362_s16   ;;  %s1008_s15 = sphi %s1062_s15, %s1361_s15  }
   0xa   : > { %p59_p0 = scmp.ne.s32.totalorder %s1012_s16, %s1008_s15  ;;  %p1096_p1 = scmp.eq.s32.totalorder %s656_s21, 0 }
   0xb   : > { %p1100_p2 = scmp.eq.s32.totalorder %s656_s21, 3  ;;  %p138_p3 = scmp.eq.s32.totalorder %s657_s22, 3 }
   0xc   : > { %s1348_s23 = scalar_select %p1096_p1, 1, 0 }
   0xd   : > { %s1349_s24 = scalar_select %p1100_p2, 1, 0 }
   0xe   : > { %p1106_p4 = por %p1096_p1, %p59_p0  ;;  %p658_p5 = scmp.ge.s32.totalorder %s1028_s20, 1 }
   0xf   : > { %p1111_p6 = por %p138_p3, %p59_p0  ;;  %p173_p7 = scmp.lt.s32.totalorder %s1028_s20, 5 }
  0x10   : > { %s1350_s25 = scalar_select %p1106_p4, 1, 0 }
  0x11   : > { %s1351_s26 = scalar_select %p1111_p6, 1, 0 }
  0x12   : > { %p1116_p8 = pnand %p658_p5, %p173_p7  ;;  %s1030_s28 = smov [#allocation5]  }
  0x13   : > { %s189_s29 = sshll.u32 %s1030_s28, 4  ;;  %s1031_s30 = smov [#allocation7]   ;;  %s190_s29 = int_to_ptr.vmem [resolvable:$true] %s189_s29 }
  0x14   : > { %s1352_s27 = scalar_select %p1116_p8, 1, 0 }
  0x15   : > { %p728_p9 = pneg %p1116_p8  ;;  %s199_s5 = sshll.u32 %s1031_s30, 4  ;;  %s1128_s5 = int_to_ptr.vmem [resolvable:$true] %s199_s5 }
  0x16   : > { %s824_s9 = scalar_lea.hbm %s1340_s1, 128 }
  0x17   : > { %p1124_p10 = pnand %p728_p9, %p1096_p1  ;;  %p825_p11 = scmp.ne.s32.totalorder %s1340_s1, %s824_s9 }
  0x18   : > { %p831_p3 = scmp.lt.u32.totalorder %s824_s9, %s1340_s1 }
  0x19   : > { %p826_p12 = pneg %p1124_p10 }
  0x1b   : > { %p827_p13 = pnand %p826_p12, %p825_p11 }
  0x1d   : > { %p828_p0 = pneg %p827_p13 }
  0x1f   : > { %p833_p5 = pnand %p831_p3, %p828_p0 }
  0x21   : > { %836 = shalt.err (!%p833_p5)
}
  0x22   : > { %s837_s14 = scalar_lea.vmem %s190_s29, 128  ;;  %p845_p1 = scmp.lt.s32.totalorder %s190_s29, %s190_s29 }
  0x23   : > { %p838_p7 = scmp.ne.s32.totalorder %s190_s29, %s837_s14  ;;  %p846_p4 = scmp.lt.s32.totalorder %s837_s14, %s837_s14 }
  0x25   : > { %p840_p9 = pnand %p838_p7, %p826_p12  ;;  %p847_p8 = por %p846_p4, %p845_p1 }
  0x27   : > { %p841_p6 = pneg %p840_p9 }
  0x29   : > { %p848_p2 = pnand %p847_p8, %p841_p6 }
  0x2b   : > { %851 = shalt.err (!%p848_p2)
}
  0x2c   : > { %731 = dma.hbm_to_vmem [thread:$0]  (!%p1124_p10), %s1340_s1, 128, %s190_s29, [#allocation6]  }
  0x2d   : > { %s852_s7 = scalar_lea.hbm %s1341_s2, 2048 }
  0x2e   : > { %p853_p11 = scmp.ne.s32.totalorder %s1341_s2, %s852_s7  ;;  %p859_p2 = scmp.lt.u32.totalorder %s852_s7, %s1341_s2 }
  0x30   : > { %p855_p1 = pnand %p853_p11, %p826_p12 }
  0x32   : > { %p856_p4 = pneg %p855_p1 }
  0x34   : > { %p861_p6 = pnand %p859_p2, %p856_p4 }
  0x36   : > { %864 = shalt.err (!%p861_p6)
}
  0x37   : > { %s865_s29 = scalar_lea.vmem %s1128_s5, 2048  ;;  %p873_p3 = scmp.lt.s32.totalorder %s1128_s5, %s1128_s5 }
  0x38   : > { %p866_p8 = scmp.ne.s32.totalorder %s1128_s5, %s865_s29  ;;  %p874_p5 = scmp.lt.s32.totalorder %s865_s29, %s865_s29 }
  0x3a   : > { %p868_p13 = pnand %p866_p8, %p826_p12  ;;  %p875_p7 = por %p874_p5, %p873_p3 }
  0x3c   : > { %p869_p0 = pneg %p868_p13 }
  0x3e   : > { %p876_p9 = pnand %p875_p7, %p869_p0 }
  0x40   : > { %879 = shalt.err (!%p876_p9)
}
  0x41   : > { %s1032_s12 = smov 64   ;;  %s1033_s13 = smov 4  }
  0x42   : > { %734 = dma.hbm_to_vmem [thread:$0]  (!%p1124_p10), %s1341_s2, 2048, %s1128_s5, [#allocation6], %s1032_s12, %s1032_s12, %s1033_s13  }
  0x43   : > { %s34_s22 = sadd.s32 1, %s1024_s19  ;;  %s46_s28 = sadd.s32 1, %s1016_s17 }
  0x44   : > { %p35_p12 = scmp.ge.s32.totalorder %s34_s22, 4  ;;  %p53_p11 = scmp.ne.s32.totalorder %s1016_s17, %s1012_s16 }
  0x45   : > { %p54_p1 = scmp.eq.s32.totalorder %s1028_s20, 0  ;;  %p748_p4 = scmp.lt.s32.totalorder %s1028_s20, 4 }
  0x46   : > { %s1367_s22 = smov (%p35_p12, %s34_s22), 0  ;;  %p1354_p6 = scmp.ne.s32.totalorder %s1349_s24, 0 }
  0x47   : > { %p55_p2 = por %p54_p1, %p53_p11  ;;  %s41_s6 = ssub.s32 %s1024_s19, %s1367_s22 }
  0x48   : > { %p1187_p8 = por %p1354_p6, %p53_p11  ;;  %s213_s7 = sand.u32 1, %s1016_s17  }
  0x49   : > { %p44_p13 = scmp.eq.s32.totalorder %s41_s6, 0  ;;  %s662_s5 = sshll.u32 %s213_s7, 3 }
  0x4a   : > { %s691_s8 = sshll.u32 %s1024_s19, 7  ;;  %s217_s24 = scalar_lea.vmem [#allocation2], %s662_s5 }
  0x4b   : > { %s1196_s9 = scalar_select %p44_p13, %s1016_s17, %s46_s28  }
  0x4c   : > { %s1201_s29 = scalar_lea.hbm %s1339_s0, %s691_s8  ;;  %s227_s12 = sshll.u32 %s217_s24, 4  ;;  %s1209_s12 = int_to_ptr.vmem [resolvable:$true] %s227_s12 }
  0x4d   : > { %p1205_p10 = pnand %p748_p4, %p55_p2  ;;  %s214_s14 = scalar_lea.sflag [#allocation3], %s213_s7 }
  0x4e   : > { %s880_s21 = scalar_lea.hbm %s1201_s29, 128  ;;  %s885_s5 = scalar_lea.hbm %s1339_s0, 512 }
  0x4f   : > { %p881_p0 = scmp.ne.s32.totalorder %s1201_s29, %s880_s21  ;;  %p882_p3 = pneg %p1205_p10 }
  0x50   : > { %p886_p9 = scmp.lt.u32.totalorder %s1201_s29, %s1339_s0  ;;  %p887_p12 = scmp.lt.u32.totalorder %s885_s5, %s880_s21 }
  0x51   : > { %p883_p5 = pnand %p882_p3, %p881_p0  ;;  %p889_p1 = scmp.lt.u32.totalorder %s880_s21, %s1201_s29 }
  0x52   : > { %p888_p11 = por %p887_p12, %p886_p9 }
  0x53   : > { %p884_p7 = pneg %p883_p5 }
  0x54   : > { %p890_p4 = por %p889_p1, %p888_p11 }
  0x56   : > { %p891_p2 = pnand %p890_p4, %p884_p7 }
  0x58   : > { %894 = shalt.err (!%p891_p2)
}
  0x59   : > { %s895_s7 = scalar_lea.vmem %s1209_s12, 128  ;;  %s1034_s11 = smov [#allocation2]  }
  0x5a   : > { %p896_p6 = scmp.ne.s32.totalorder %s1209_s12, %s895_s7  ;;  %s900_s24 = sshll.u32 %s1034_s11, 4  ;;  %s901_s24 = int_to_ptr.vmem [resolvable:$false] %s900_s24 }
  0x5b   : > { %s902_s28 = scalar_lea.vmem %s901_s24, 256  ;;  %p903_p5 = scmp.lt.s32.totalorder %s1209_s12, %s901_s24 }
  0x5c   : > { %p898_p13 = pnand %p896_p6, %p882_p3  ;;  %p904_p9 = scmp.lt.s32.totalorder %s902_s28, %s895_s7 }
  0x5e   : > { %p899_p0 = pneg %p898_p13  ;;  %p905_p12 = por %p904_p9, %p903_p5 }
  0x60   : > { %p906_p11 = pnand %p905_p12, %p899_p0 }
  0x62   : > { %909 = shalt.err (!%p906_p11)
}
  0x63   : > { %738 = dma.hbm_to_vmem [thread:$0]  (!%p1205_p10), %s1201_s29, 128, %s1209_s12, %s214_s14  }
  0x64   : > { %p1357_p7 = scmp.ne.s32.totalorder %s1352_s27, 0 }
  0x65   : > { %s1239_s21 = sand.u32 (!%p1357_p7), 1, %s1012_s16   ;;  %p1358_p3 = scmp.ne.s32.totalorder (!%p1357_p7), %s1350_s25, 0 }
  0x66   : > { %236 = sbr.rel (%p1357_p7) target bundleno = 695 (0x2b7), region = 32  ;;  %s666_s6 = sshll.u32 (!%p1357_p7), %s1239_s21, 3 }
  0x67   : > { %s239_s5 = scalar_lea.sflag (!%p1357_p7), [#allocation3], %s1239_s21  ;;  %s242_s8 = scalar_lea.vmem (!%p1357_p7), [#allocation2], %s666_s6 }
  0x6d   : > { %991 = dma.done.wait (%p1358_p3), %s239_s5, 128  }
  0x6e   : > { %993 = vsyncadd (%p1358_p3), %s239_s5, 4294967168  ;;  %p1359_p1 = scmp.ne.s32.totalorder %s1348_s23, 0 }
  0x70   : > { %995 = dma.done.wait (%p1359_p1), [#allocation6], 2176  }
  0x71   : > { %997 = vsyncadd (%p1359_p1), [#allocation6], 4294965120  ;;  %v804_v0 = vld [vmem:[#allocation7 + $0x40] sm:$0xff]   ;;  %v806_v2 = vld [vmem:[#allocation7 + $0x48] sm:$0xff]   ;;  %vm456_vm0 = vcmask 1043456   ;;  %s278_s23 = scalar_lea.vmem [#allocation9], %s1239_s21 }
  0x72   : > { %v805_v1 = vld [vmem:[#allocation7] sm:$0xff]   ;;  %692 = vmatprep.subr.bf16.mxu0 %v804_v0  ;;  %v807_v3 = vld [vmem:[#allocation7 + $0x8] sm:$0xff]   ;;  %v808_v4 = vld [vmem:[#allocation7 + $0x50] sm:$0xff]   ;;  %s688_s25 = sshll.u32 %s1020_s18, 4  ;;  %s523_s27 = sshll.u32 %s278_s23, 4  ;;  %s524_s27 = int_to_ptr.vmem [resolvable:$true] %s523_s27 }
  0x73   : > { %693 = vmatpush3.bf16.msra.mxu0 %v805_v1  ;;  %v809_v5 = vld [vmem:[#allocation7 + $0x10] sm:$0xff]   ;;  %v810_v6 = vld [vmem:[#allocation7 + $0x58] sm:$0xff]   ;;  %v812_v8 = vld [vmem:[#allocation7 + $0x60] sm:$0xff]   ;;  %s1265_s13 = scalar_lea.hbm %s1343_s4, %s688_s25  ;;  %s495_s14 = scalar_lea.sflag [#allocation10], %s1239_s21 }
  0x74   : > { %694 = vmatprep.subr.bf16.mxu0 %v806_v2  ;;  %v811_v7 = vld [vmem:[#allocation7 + $0x18] sm:$0xff]   ;;  %v813_v9 = vld [vmem:[#allocation7 + $0x20] sm:$0xff]   ;;  %v814_v10 = vld [vmem:[#allocation7 + $0x68] sm:$0xff]   ;;  %s910_s10 = scalar_lea.vmem %s524_s27, 16  ;;  %s1035_s7 = smov [#allocation9]  }
  0x75   : > { %v280_v11 = vld [vmem:[%s242_s8] sm:$0xff]  ;;  %v281_v12 = vld [vmem:[#allocation5] sm:$0xff]  ;;  %p911_p10 = scmp.ne.s32.totalorder %s524_s27, %s910_s10  ;;  %s914_s11 = sshll.u32 %s1035_s7, 4  ;;  %s915_s11 = int_to_ptr.vmem [resolvable:$false] %s914_s11 }
  0x76   : > { %v314_v13 = vadd.f32 %v281_v12, %v280_v11  ;;  %v815_v14 = vld [vmem:[#allocation7 + $0x28] sm:$0xff]   ;;  %v816_v16 = vld [vmem:[#allocation7 + $0x70] sm:$0xff]   ;;  %v818_v19 = vld [vmem:[#allocation7 + $0x78] sm:$0xff]   ;;  %v472_v28 = vmul.f32 %v280_v11, %v280_v11  ;;  %s916_s24 = scalar_lea.vmem %s915_s11, 32  ;;  %p917_p6 = scmp.lt.s32.totalorder %s524_s27, %s915_s11 }
  0x77   : > { %695 = vmatpush3.bf16.msra.mxu0 %v807_v3  ;;  %v817_v18 = vld [vmem:[#allocation7 + $0x30] sm:$0xff]   ;;  %v819_v20 = vld [vmem:[#allocation7 + $0x38] sm:$0xff]   ;;  %p912_p4 = pnand %p911_p10, %p1187_p8  ;;  %p918_p13 = scmp.lt.s32.totalorder %s916_s24, %s910_s10 }
  0x78   : > { %696 = vmatprep.subr.bf16.mxu0 %v808_v4  ;;  %v316_v15 = vcombine.high %v314_v13, %v314_v13  ;;  %v318_v21 = vpack.c.bf16 %v314_v13, %v314_v13  ;;  %v474_v29 = vcombine.high %v472_v28, %v472_v28  ;;  %v476_v30 = vsel %vm456_vm0, %v472_v28, 0.0 }
  0x79   : > { %p913_p2 = pneg %p912_p4  ;;  %p919_p0 = por %p918_p13, %p917_p6 }
  0x7a   : > { %v319_v17 = vpack.c.bf16 %v316_v15, %v316_v15  ;;  %v477_v31 = vsel %vm456_vm0, %v474_v29, 0.0 }
  0x7b   : > { %697 = vmatpush3.bf16.msra.mxu0 %v809_v5  ;;  %v478_v32 = vadd.f32 %v477_v31, %v476_v30  ;;  %p920_p5 = pnand %p919_p0, %p913_p2 }
  0x7c   : > { %698 = vmatprep.subr.bf16.mxu0 %v810_v6  ;;  %448 = vmatprep.mubr.bf16.mxu0 %v319_v17 }
  0x7d   : > { %479 = vadd.xlane.f32.xlu1 %v478_v32 }
  0x7f   : > { %699 = vmatpush3.bf16.msra.mxu0 %v811_v7 }
  0x80   : > { %700 = vmatprep.subr.bf16.mxu0 %v812_v8 }
  0x83   : > { %701 = vmatpush3.bf16.msra.mxu0 %v813_v9 }
  0x84   : > { %702 = vmatprep.subr.bf16.mxu0 %v814_v10 }
  0x87   : > { %703 = vmatpush3.bf16.msra.mxu0 %v815_v14 }
  0x88   : > { %704 = vmatprep.subr.bf16.mxu0 %v816_v16 }
  0x8b   : > { %705 = vmatpush3.bf16.msra.mxu0 %v817_v18 }
  0x8c   : > { %706 = vmatprep.subr.bf16.mxu0 %v818_v19 }
  0x8f   : > { %707 = vmatpush3.bf16.msra.mxu0 %v819_v20 }
  0x92   : > { %449 = vmatmul.mubr.bf16.vlgmr.msra.gmra.mrb[0].mxu0 %v318_v21 }
 0x10a   : > { %v480_v38 = vpop.xlane.xlu1 %479 }
 0x10b   : > { %v481_v39 = vsel %vm456_vm0, %v480_v38, 0.0 }
 0x10c   : > { %v482_v40 = vrot.slane %v481_v39, 4 }
 0x10e   : > { %v483_v41 = vadd.f32 %v482_v40, %v481_v39 }
 0x110   : > { %v484_v42 = vrot.slane %v483_v41, 2 }
 0x112   : > { %v485_v43 = vadd.f32 %v484_v42, %v483_v41 }
 0x114   : > { %v486_v44 = vrot.slane %v485_v43, 1 }
 0x116   : > { %v487_v45 = vadd.f32 %v486_v44, %v485_v43 }
 0x118   : > { %488 = vst [vmem:[%s278_s23] sm:$0x1] %v487_v45 }
 0x165   : > { %v708_v22 = vpop.f32.mrb[0].mxu0 }
 0x166   : > { %v709_v23 = vpop.f32.mrb[1].mxu0 }
 0x167   : > { %v1251_v24 = vadd.f32 %v709_v23, %v708_v22  ;;  %v711_v25 = vpop.f32.mrb[2].mxu0 }
 0x168   : > { %v712_v26 = vpop.f32.mrb[3].mxu0 }
 0x169   : > { %v457_v27 = vsel %vm456_vm0, %v1251_v24, -inf }
 0x16a   : > { %458 = vmax.xlane.f32.xlu0 %v457_v27 }
 0x1f7   : > { %v459_v33 = vpop.xlane.xlu0 %458 }
 0x1f8   : > { %v460_v34 = vsub.f32 %v1251_v24, %v459_v33 }
 0x1fa   : > { %v461_v35 = vmul.f32 1.442695, %v460_v34 }
 0x1fc   : > { %820 = vpow2.f32 %v461_v35 }
 0x206   : > { %v821_v36 = vpop.eup %820 }
 0x207   : > { %v463_v37 = vsel %vm456_vm0, %v821_v36, 0.0 }
 0x208   : > { %464 = vadd.xlane.f32.xlu0 %v463_v37 }
 0x209   : > { %923 = shalt.err (!%p920_p5)
}
 0x20a   : > { %s924_s28 = scalar_lea.hbm %s1265_s13, 16  ;;  %s928_s8 = scalar_lea.hbm %s1343_s4, 64 }
 0x20b   : > { %p925_p9 = scmp.ne.s32.totalorder %s1265_s13, %s924_s28  ;;  %p929_p7 = scmp.lt.u32.totalorder %s1265_s13, %s1343_s4 }
 0x20c   : > { %p930_p3 = scmp.lt.u32.totalorder %s928_s8, %s924_s28  ;;  %p932_p10 = scmp.lt.u32.totalorder %s924_s28, %s1265_s13 }
 0x20d   : > { %p926_p12 = pnand %p925_p9, %p1187_p8 }
 0x20e   : > { %p931_p1 = por %p930_p3, %p929_p7 }
 0x20f   : > { %p927_p11 = pneg %p926_p12 }
 0x210   : > { %p933_p4 = por %p932_p10, %p931_p1 }
 0x212   : > { %p934_p2 = pnand %p933_p4, %p927_p11 }
 0x214   : > { %937 = shalt.err (!%p934_p2)
}
 0x215   : > { %725 = dma.vmem_to_hbm [thread:$0]  (%p1187_p8), %s524_s27, 16, %s1265_s13, %s495_s14  }
 0x216   : > { %s669_s29 = sshll.u32 %s1239_s21, 2  ;;  %s687_s12 = sshll.u32 %s1020_s18, 6 }
 0x217   : > { %s272_s10 = scalar_lea.vmem [#allocation8], %s669_s29  ;;  %s1291_s28 = scalar_lea.hbm %s1342_s3, %s687_s12 }
 0x218   : > { %s508_s7 = sshll.u32 %s272_s10, 4  ;;  %s490_s27 = scalar_lea.sflag [#allocation4], %s1239_s21  ;;  %s1293_s7 = int_to_ptr.vmem [resolvable:$true] %s508_s7 }
 0x219   : > { %s938_s13 = scalar_lea.vmem %s1293_s7, 64  ;;  %s1036_s18 = smov [#allocation8]  }
 0x21a   : > { %p939_p6 = scmp.ne.s32.totalorder %s1293_s7, %s938_s13  ;;  %s942_s14 = sshll.u32 %s1036_s18, 4  ;;  %s943_s14 = int_to_ptr.vmem [resolvable:$false] %s942_s14 }
 0x21b   : > { %s944_s6 = scalar_lea.vmem %s943_s14, 128  ;;  %p945_p5 = scmp.lt.s32.totalorder %s1293_s7, %s943_s14 }
 0x21c   : > { %p940_p13 = pnand %p939_p6, %p1187_p8  ;;  %p946_p9 = scmp.lt.s32.totalorder %s944_s6, %s938_s13 }
 0x21e   : > { %p941_p0 = pneg %p940_p13  ;;  %p947_p12 = por %p946_p9, %p945_p5 }
 0x220   : > { %p948_p11 = pnand %p947_p12, %p941_p0 }
 0x295   : > { %v465_v46 = vpop.xlane.xlu0 %464 }
 0x296   : > { %822 = vlog2.f32 %v465_v46 }
 0x2a0   : > { %v823_v47 = vpop.eup %822 }
 0x2a1   : > { %v467_v48 = vmul.f32 0.6931472, %v823_v47 }
 0x2a3   : > { %v468_v49 = vadd.f32 %v467_v48, %v459_v33 }
 0x2a5   : > { %v469_v50 = vadd.f32 3.912023, %v468_v49 }
 0x2a7   : > { %v470_v51 = vsub.f32 %v1251_v24, %v469_v50 }
 0x2a9   : > { %471 = vst [vmem:[%s272_s10] sm:$0xf] %v470_v51 }
 0x2aa   : > { %951 = shalt.err (!%p948_p11)
}
 0x2ab   : > { %s952_s21 = scalar_lea.hbm %s1291_s28, 64  ;;  %s956_s23 = scalar_lea.hbm %s1342_s3, 256 }
 0x2ac   : > { %p953_p7 = scmp.ne.s32.totalorder %s1291_s28, %s952_s21  ;;  %p957_p10 = scmp.lt.u32.totalorder %s1291_s28, %s1342_s3 }
 0x2ad   : > { %p958_p4 = scmp.lt.u32.totalorder %s956_s23, %s952_s21  ;;  %p960_p6 = scmp.lt.u32.totalorder %s952_s21, %s1291_s28 }
 0x2ae   : > { %p954_p3 = pnand %p953_p7, %p1187_p8 }
 0x2af   : > { %p959_p2 = por %p958_p4, %p957_p10 }
 0x2b0   : > { %p955_p1 = pneg %p954_p3 }
 0x2b1   : > { %p961_p13 = por %p960_p6, %p959_p2 }
 0x2b3   : > { %p962_p0 = pnand %p961_p13, %p955_p1 }
 0x2b5   : > { %965 = shalt.err (!%p962_p0)
}
 0x2b6   : > { %724 = dma.vmem_to_hbm [thread:$0]  (%p1187_p8), %s1293_s7, 64, %s1291_s28, %s490_s27  }
 0x2b7 PF: > { %p751_p5 = scmp.ge.s32.totalorder %s1028_s20, 2  ;;  %s535_s12 = sand.u32 1, %s1008_s15  }
 0x2b8   : > { %p1360_p9 = scmp.ne.s32.totalorder %s1351_s26, 0  ;;  %s536_s10 = scalar_lea.sflag [#allocation4], %s535_s12 }
 0x2ba   : > { %p740_p12 = pnand %p751_p5, %p1360_p9 }
 0x2bc   : > { %999 = dma.done.wait (!%p740_p12), %s536_s10, 64  }
 0x2bd   : > { %1001 = vsyncadd (!%p740_p12), %s536_s10, 4294967232  ;;  %s545_s11 = scalar_lea.sflag [#allocation10], %s535_s12 }
 0x2be   : > { %1003 = dma.done.wait (!%p740_p12), %s545_s11, 16  }
 0x2bf   : > { %1005 = vsyncadd (!%p740_p12), %s545_s11, 4294967280  ;;  %s25_s20 = sadd.s32 1, %s1028_s20   ;;  %s1361_s15 = smov %s1012_s16 }
 0x2c0   : > { %p22_p11 = scmp.ge.s32.totalorder %s25_s20, 6   ;;  %s1362_s16 = smov %s1016_s17 }
 0x2c1   : > { %s1363_s17 = smov %s1196_s9  ;;  %s1364_s18 = smov %s1024_s19 }
 0x2c2   : > { %s1365_s19 = smov %s1367_s22  ;;  %24 = sbr.rel (!%p22_p11) target bundleno = 9 (0x9), region = 103 }
 0x2c9   :  { %549 = vsyncpa [#allocation3], 1 }
 0x2ca   :  { %551 = vsyncpa [#allocation3 + $0x1], 1 }
 0x2cb   :  { %552 = vsyncpa [#allocation6], 1 }
 0x2cc   :  { %553 = vsyncpa [#allocation4], 1 }
 0x2cd   :  { %555 = vsyncpa [#allocation4 + $0x1], 1 }
 0x2ce   :  { %556 = vsyncpa [#allocation10], 1 }
 0x2cf   :  { %558 = vsyncpa [#allocation10 + $0x1], 1 }

</bundles_post_ra>
